<compile_context>
chip_gen: v7x
topology: tpu7x:2x2x1
jax: 0.10.0
libtpu: 0.0.40
codegen_flags: <defaults>
</compile_context>

<pallas_src>
import functools
import math

import numpy as np
import jax
import jax.numpy as jnp
from jax import lax
from jax.experimental import pallas as pl
from jax.experimental.pallas import tpu as pltpu

BN_EPS = 1e-5
TAPS = [(0, 0), (0, 1), (0, 2),
        (1, 0), (1, 1), (1, 2),
        (2, 0), (2, 1), (2, 2)]


# ------------------------------------------------------------------------
# Static per-tap boundary masks (replace explicit zero padding)
# ------------------------------------------------------------------------
def _tap_masks(H, W, d):
    """f32 0/1 validity mask per 3x3 tap on the flattened H*W grid."""
    hh, ww = np.meshgrid(np.arange(H), np.arange(W), indexing="ij")
    rows = []
    for dh, dw in TAPS:
        oh, ow = (dh - 1) * d, (dw - 1) * d
        valid = ((hh + oh >= 0) & (hh + oh < H) &
                 (ww + ow >= 0) & (ww + ow < W))
        rows.append(valid.reshape(-1))
    return np.stack(rows).astype(np.float32)          # (9, H*W)


# ------------------------------------------------------------------------
# Pallas kernel
# ------------------------------------------------------------------------
def _rebnconv_kernel(x_ref, w_ref, mask_ref, scale_ref, shift_ref, out_ref,
                     *, H, W, d):
    """Fused 3x3 dilated conv + folded BN(+bias) + ReLU for one batch element.

    x_ref:     (1, Cin_pad, H*W)  activation, spatial flattened on lanes
    w_ref:     (Cout, 9*Cin_pad)  conv weight, columns ordered (tap, cin)
    mask_ref:  (9, H*W)           per-tap boundary masks
    scale_ref: (Cout, 1)          folded BN scale
    shift_ref: (Cout, 1)          folded BN shift (conv bias already folded in)
    out_ref:   (1, Cout, H*W)
    """
    HW = H * W
    x = x_ref[0]                                      # (Cin_pad, HW)
    masks = mask_ref[...]                             # (9, HW)

    # Build the im2col operand with lane rolls + boundary masks (XLU/VPU work,
    # no padded copy of the activation is ever materialized).
    cols = []
    for idx, (dh, dw) in enumerate(TAPS):
        off = ((dh - 1) * W + (dw - 1)) * d           # flat-index offset of tap
        if off == 0:                                  # center tap: always valid
            cols.append(x)
        else:
            shifted = pltpu.roll(x, shift=(-off) % HW, axis=1)
            cols.append(shifted * masks[idx:idx + 1])
    patches = jnp.concatenate(cols, axis=0)           # (9*Cin_pad, HW)

    # Single MXU matmul: (Cout, 9*Cin_pad) @ (9*Cin_pad, HW) -> (Cout, HW)
    acc = jnp.dot(w_ref[...], patches,
                  preferred_element_type=jnp.float32,
                  precision=lax.Precision.HIGHEST)
    acc = acc * scale_ref[...] + shift_ref[...]       # folded BN (+ conv bias)
    out_ref[0] = jnp.maximum(acc, 0.0)                # ReLU, lane-dense store


# ------------------------------------------------------------------------
# Wrapper (NCHW in / NCHW out, like the PyTorch module)
# ------------------------------------------------------------------------
def rebnconv(x_nchw, params, dirate=1):
    """REBNCONV forward: x (N, Cin, H, W) f32 -> (N, Cout, H, W) f32."""
    N, Cin, H, W = x_nchw.shape
    Cout = params["w"].shape[-1]
    HW = H * W
    d = int(dirate)

    # Pad Cin to a multiple of 8 (f32 sublane tile) so the in-kernel im2col
    # concatenation is tile-aligned; zero channels x zero weights is a no-op.
    Cinp = -(-Cin // 8) * 8
    xf = x_nchw.reshape(N, Cin, HW)                   # free reshape
    w = params["w"]                                   # (3, 3, Cin, Cout) HWIO
    if Cinp != Cin:
        xf = jnp.pad(xf, ((0, 0), (0, Cinp - Cin), (0, 0)))
        w = jnp.pad(w, ((0, 0), (0, 0), (0, Cinp - Cin), (0, 0)))
    w2 = w.reshape(9 * Cinp, Cout).T                  # (Cout, 9*Cinp), (tap,cin) cols

    # Fold conv bias + BatchNorm (eval mode) into a single scale / shift.
    scale = params["gamma"] / jnp.sqrt(params["var"] + BN_EPS)
    shift = (params["b"] - params["mean"]) * scale + params["beta"]

    masks = jnp.asarray(_tap_masks(H, W, d))          # (9, HW)

    kernel = functools.partial(_rebnconv_kernel, H=H, W=W, d=d)
    out = pl.pallas_call(
        kernel,
        out_shape=jax.ShapeDtypeStruct((N, Cout, HW), jnp.float32),
        grid=(N,),
        in_specs=[
            pl.BlockSpec((1, Cinp, HW), lambda n: (n, 0, 0)),
            pl.BlockSpec((Cout, 9 * Cinp), lambda n: (0, 0)),
            pl.BlockSpec((9, HW), lambda n: (0, 0)),
            pl.BlockSpec((Cout, 1), lambda n: (0, 0)),
            pl.BlockSpec((Cout, 1), lambda n: (0, 0)),
        ],
        out_specs=pl.BlockSpec((1, Cout, HW), lambda n: (n, 0, 0)),
        compiler_params=pltpu.CompilerParams(
            dimension_semantics=("parallel",)),
    )(xf, w2, masks, scale.reshape(Cout, 1), shift.reshape(Cout, 1))
    return out.reshape(N, Cout, H, W)                 # free reshape


# ------------------------------------------------------------------------
# Deterministic parameter initialization (PyTorch-like fan-in bounds)
# ------------------------------------------------------------------------
def init_rebnconv(key, cin, cout):
    ks = jax.random.split(key, 6)
    bound = 1.0 / math.sqrt(cin * 9)
    return dict(
        w=jax.random.uniform(ks[0], (3, 3, cin, cout), jnp.float32, -bound, bound),
        b=jax.random.uniform(ks[1], (cout,), jnp.float32, -bound, bound),
        gamma=jax.random.uniform(ks[2], (cout,), jnp.float32, 0.5, 1.5),
        beta=jax.random.uniform(ks[3], (cout,), jnp.float32, -0.1, 0.1),
        mean=jax.random.uniform(ks[4], (cout,), jnp.float32, -0.1, 0.1),
        var=jax.random.uniform(ks[5], (cout,), jnp.float32, 0.5, 1.5),
    )


# ------------------------------------------------------------------------
# Pure-JAX reference (for correctness check)
# ------------------------------------------------------------------------
def rebnconv_ref(x_nchw, p, dirate=1):
    d = int(dirate)
    y = lax.conv_general_dilated(
        x_nchw, p["w"], (1, 1), [(d, d), (d, d)], rhs_dilation=(d, d),
        dimension_numbers=("NCHW", "HWIO", "NCHW"),
        precision=lax.Precision.HIGHEST)
    y = y + p["b"][None, :, None, None]
    scale = p["gamma"] / jnp.sqrt(p["var"] + BN_EPS)
    y = ((y - p["mean"][None, :, None, None]) * scale[None, :, None, None]
         + p["beta"][None, :, None, None])
    return jnp.maximum(y, 0.0)


# ------------------------------------------------------------------------
if __name__ == "__main__":
    in_ch, out_ch = 4, 16
    N, H, W = 2, 16, 16

    root = jax.random.PRNGKey(0)
    kp, kx = jax.random.split(root)
    params = init_rebnconv(kp, in_ch, out_ch)
    x = jax.random.normal(kx, (N, in_ch, H, W), jnp.float32)   # NCHW input

    fwd = jax.jit(rebnconv, static_argnums=(2,))
    for d in (1, 2):                    # default dirate=1 plus a dilated case
        out = jax.block_until_ready(fwd(x, params, d))
        assert out.shape == (N, out_ch, H, W)
        ref = jax.block_until_ready(rebnconv_ref(x, params, d))
        np.testing.assert_allclose(np.asarray(out), np.asarray(ref),
                                   rtol=1e-4, atol=1e-4)
    print("KERNEL_OK")
</pallas_src>

<mosaic_0001>
module attributes {stable_mosaic.version = 11 : i64} {
  func.func @_rebnconv_kernel(%arg0: i32, %arg1: memref<1x8x256xf32, #tpu.memory_space<vmem>>, %arg2: memref<16x72xf32, #tpu.memory_space<vmem>>, %arg3: memref<9x256xf32, #tpu.memory_space<vmem>>, %arg4: memref<16x1xf32, #tpu.memory_space<vmem>>, %arg5: memref<16x1xf32, #tpu.memory_space<vmem>>, %arg6: memref<1x16x256xf32, #tpu.memory_space<vmem>>) attributes {dimension_semantics = [#tpu.dimension_semantics<parallel>], iteration_bounds = array<i64: 2>, scalar_prefetch = 0 : i64, scratch_operands = 0 : i64, tpu.core_type = #tpu.core_type<tc>, window_params = [{transform_indices = @transform_0, window_bounds = array<i64: 1, 8, 256>}, {pipeline_mode = #tpu.pipeline_mode<synchronous>, transform_indices = @transform_1, window_bounds = array<i64: 16, 72>}, {pipeline_mode = #tpu.pipeline_mode<synchronous>, transform_indices = @transform_2, window_bounds = array<i64: 9, 256>}, {pipeline_mode = #tpu.pipeline_mode<synchronous>, transform_indices = @transform_3, window_bounds = array<i64: 16, 1>}, {pipeline_mode = #tpu.pipeline_mode<synchronous>, transform_indices = @transform_4, window_bounds = array<i64: 16, 1>}, {transform_indices = @transform_5, window_bounds = array<i64: 1, 16, 256>}]} {
    %c0 = arith.constant 0 : index
    %c0_0 = arith.constant 0 : index
    %c0_1 = arith.constant 0 : index
    %0 = vector.load %arg1[%c0, %c0_0, %c0_1] : memref<1x8x256xf32, #tpu.memory_space<vmem>>, vector<1x8x256xf32>
    %1 = vector.shape_cast %0 : vector<1x8x256xf32> to vector<8x256xf32>
    %c0_2 = arith.constant 0 : index
    %c0_3 = arith.constant 0 : index
    %2 = vector.load %arg3[%c0_2, %c0_3] : memref<9x256xf32, #tpu.memory_space<vmem>>, vector<9x256xf32>
    %c17_i32 = arith.constant 17 : i32
    %3 = tpu.dynamic_rotate %1 by %c17_i32 dim 1 : vector<8x256xf32>, i32 -> vector<8x256xf32>
    %4 = vector.extract_strided_slice %2 {offsets = [0, 0], sizes = [1, 256], strides = [1, 1]} : vector<9x256xf32> to vector<1x256xf32>
    %5 = vector.broadcast %4 : vector<1x256xf32> to vector<8x256xf32>
    %6 = arith.mulf %3, %5 : vector<8x256xf32>
    %c16_i32 = arith.constant 16 : i32
    %7 = tpu.dynamic_rotate %1 by %c16_i32 dim 1 : vector<8x256xf32>, i32 -> vector<8x256xf32>
    %8 = vector.extract_strided_slice %2 {offsets = [1, 0], sizes = [1, 256], strides = [1, 1]} : vector<9x256xf32> to vector<1x256xf32>
    %9 = vector.broadcast %8 : vector<1x256xf32> to vector<8x256xf32>
    %10 = arith.mulf %7, %9 : vector<8x256xf32>
    %c15_i32 = arith.constant 15 : i32
    %11 = tpu.dynamic_rotate %1 by %c15_i32 dim 1 : vector<8x256xf32>, i32 -> vector<8x256xf32>
    %12 = vector.extract_strided_slice %2 {offsets = [2, 0], sizes = [1, 256], strides = [1, 1]} : vector<9x256xf32> to vector<1x256xf32>
    %13 = vector.broadcast %12 : vector<1x256xf32> to vector<8x256xf32>
    %14 = arith.mulf %11, %13 : vector<8x256xf32>
    %c1_i32 = arith.constant 1 : i32
    %15 = tpu.dynamic_rotate %1 by %c1_i32 dim 1 : vector<8x256xf32>, i32 -> vector<8x256xf32>
    %16 = vector.extract_strided_slice %2 {offsets = [3, 0], sizes = [1, 256], strides = [1, 1]} : vector<9x256xf32> to vector<1x256xf32>
    %17 = vector.broadcast %16 : vector<1x256xf32> to vector<8x256xf32>
    %18 = arith.mulf %15, %17 : vector<8x256xf32>
    %c255_i32 = arith.constant 255 : i32
    %19 = tpu.dynamic_rotate %1 by %c255_i32 dim 1 : vector<8x256xf32>, i32 -> vector<8x256xf32>
    %20 = vector.extract_strided_slice %2 {offsets = [5, 0], sizes = [1, 256], strides = [1, 1]} : vector<9x256xf32> to vector<1x256xf32>
    %21 = vector.broadcast %20 : vector<1x256xf32> to vector<8x256xf32>
    %22 = arith.mulf %19, %21 : vector<8x256xf32>
    %c241_i32 = arith.constant 241 : i32
    %23 = tpu.dynamic_rotate %1 by %c241_i32 dim 1 : vector<8x256xf32>, i32 -> vector<8x256xf32>
    %24 = vector.extract_strided_slice %2 {offsets = [6, 0], sizes = [1, 256], strides = [1, 1]} : vector<9x256xf32> to vector<1x256xf32>
    %25 = vector.broadcast %24 : vector<1x256xf32> to vector<8x256xf32>
    %26 = arith.mulf %23, %25 : vector<8x256xf32>
    %c240_i32 = arith.constant 240 : i32
    %27 = tpu.dynamic_rotate %1 by %c240_i32 dim 1 : vector<8x256xf32>, i32 -> vector<8x256xf32>
    %28 = vector.extract_strided_slice %2 {offsets = [7, 0], sizes = [1, 256], strides = [1, 1]} : vector<9x256xf32> to vector<1x256xf32>
    %29 = vector.broadcast %28 : vector<1x256xf32> to vector<8x256xf32>
    %30 = arith.mulf %27, %29 : vector<8x256xf32>
    %c239_i32 = arith.constant 239 : i32
    %31 = tpu.dynamic_rotate %1 by %c239_i32 dim 1 : vector<8x256xf32>, i32 -> vector<8x256xf32>
    %32 = vector.extract_strided_slice %2 {offsets = [8, 0], sizes = [1, 256], strides = [1, 1]} : vector<9x256xf32> to vector<1x256xf32>
    %33 = vector.broadcast %32 : vector<1x256xf32> to vector<8x256xf32>
    %34 = arith.mulf %31, %33 : vector<8x256xf32>
    %35 = tpu.concatenate %6, %10, %14, %18, %1, %22, %26, %30, %34 in 0 : vector<8x256xf32>, vector<8x256xf32>, vector<8x256xf32>, vector<8x256xf32>, vector<8x256xf32>, vector<8x256xf32>, vector<8x256xf32>, vector<8x256xf32>, vector<8x256xf32> -> vector<72x256xf32>
    %c0_4 = arith.constant 0 : index
    %c0_5 = arith.constant 0 : index
    %36 = vector.load %arg2[%c0_4, %c0_5] : memref<16x72xf32, #tpu.memory_space<vmem>>, vector<16x72xf32>
    %cst = arith.constant dense<0.000000e+00> : vector<16x256xf32>
    %37 = tpu.matmul %36, %35, %cst {dimension_numbers = #tpu.dot_dimension_numbers<[1], [0], [0], [1], [0, 0, 1, 1], [], []>, precision = #tpu.contract_precision<fp32>} : vector<16x72xf32>, vector<72x256xf32>, vector<16x256xf32> -> vector<16x256xf32>
    %c0_6 = arith.constant 0 : index
    %c0_7 = arith.constant 0 : index
    %38 = vector.load %arg4[%c0_6, %c0_7] : memref<16x1xf32, #tpu.memory_space<vmem>>, vector<16x1xf32>
    %39 = vector.broadcast %38 : vector<16x1xf32> to vector<16x256xf32>
    %40 = arith.mulf %37, %39 : vector<16x256xf32>
    %c0_8 = arith.constant 0 : index
    %c0_9 = arith.constant 0 : index
    %41 = vector.load %arg5[%c0_8, %c0_9] : memref<16x1xf32, #tpu.memory_space<vmem>>, vector<16x1xf32>
    %42 = vector.broadcast %41 : vector<16x1xf32> to vector<16x256xf32>
    %43 = arith.addf %40, %42 : vector<16x256xf32>
    %cst_10 = arith.constant 0.000000e+00 : f32
    %44 = vector.broadcast %cst_10 : f32 to vector<16x256xf32>
    %45 = arith.maximumf %43, %44 : vector<16x256xf32>
    %c0_11 = arith.constant 0 : index
    %c0_12 = arith.constant 0 : index
    %c0_13 = arith.constant 0 : index
    %46 = vector.load %arg6[%c0_11, %c0_12, %c0_13] : memref<1x16x256xf32, #tpu.memory_space<vmem>>, vector<1x16x256xf32>
    %47 = vector.shape_cast %46 : vector<1x16x256xf32> to vector<16x256xf32>
    %48 = vector.shape_cast %45 : vector<16x256xf32> to vector<1x16x256xf32>
    tpu.vector_store %arg6[%c0_11, %c0_12, %c0_13], %48 {strides = array<i32>} : memref<1x16x256xf32, #tpu.memory_space<vmem>>, vector<1x16x256xf32>,
    return
  }
  func.func @transform_0(%arg0: i32) -> (i32, i32, i32) {
    %c0_i32 = arith.constant 0 : i32
    %c0_i32_0 = arith.constant 0 : i32
    %c0_i32_1 = arith.constant 0 : i32
    return %arg0, %c0_i32, %c0_i32_0 : i32, i32, i32
  }
  func.func @transform_1(%arg0: i32) -> (i32, i32) {
    %c0_i32 = arith.constant 0 : i32
    %c0_i32_0 = arith.constant 0 : i32
    %c0_i32_1 = arith.constant 0 : i32
    return %c0_i32, %c0_i32_0 : i32, i32
  }
  func.func @transform_2(%arg0: i32) -> (i32, i32) {
    %c0_i32 = arith.constant 0 : i32
    %c0_i32_0 = arith.constant 0 : i32
    %c0_i32_1 = arith.constant 0 : i32
    return %c0_i32, %c0_i32_0 : i32, i32
  }
  func.func @transform_3(%arg0: i32) -> (i32, i32) {
    %c0_i32 = arith.constant 0 : i32
    %c0_i32_0 = arith.constant 0 : i32
    %c0_i32_1 = arith.constant 0 : i32
    return %c0_i32, %c0_i32_0 : i32, i32
  }
  func.func @transform_4(%arg0: i32) -> (i32, i32) {
    %c0_i32 = arith.constant 0 : i32
    %c0_i32_0 = arith.constant 0 : i32
    %c0_i32_1 = arith.constant 0 : i32
    return %c0_i32, %c0_i32_0 : i32, i32
  }
  func.func @transform_5(%arg0: i32) -> (i32, i32, i32) {
    %c0_i32 = arith.constant 0 : i32
    %c0_i32_0 = arith.constant 0 : i32
    %c0_i32_1 = arith.constant 0 : i32
    return %arg0, %c0_i32, %c0_i32_0 : i32, i32, i32
  }
}

</mosaic_0001>

<bundles_post_ra>
// kernel: rebnconv.1
= control target key start
LH: loop header
LB: loop body
LE: loop exit
PB: predicated region body
PF: predicated region fallthrough
CT: control target
= control target key end

     0   :  { %s1394_s18 = smov 0   ;;  %s1797_s0 = inlined_call_operand.vmem [shape: f32[2,8,256], index: 0, kind: input, shape index: {}]   ;;  %s1798_s1 = inlined_call_operand.vmem [shape: f32[16,72], index: 1, kind: input, shape index: {}]   ;;  %s1799_s2 = inlined_call_operand.vmem [shape: f32[9,256], index: 2, kind: input, shape index: {}]   ;;  %s1800_s3 = inlined_call_operand.vmem [shape: f32[16,1], index: 3, kind: input, shape index: {}]   ;;  %s1801_s4 = inlined_call_operand.vmem [shape: f32[16,1], index: 4, kind: input, shape index: {}]   ;;  %s1802_s5 = inlined_call_operand.vmem [shape: f32[2,16,256], index: 5, kind: output, shape index: {}]  }
   0x1 LB: > { %s1195_s19 = sadd.s32 4294967295, %s1352_s18   ;;  %p1199_p0 = scmp.ge.s32.totalorder %s1352_s18, 1  ;;  %s1352_s18 = sphi %s1394_s18, %s15_s18  }
   0x2   : > { %p187_p1 = scmp.lt.s32.totalorder %s1352_s18, 3 }
   0x4   : > { %p188_p2 = pnand %p1199_p0, %p187_p1 }
   0x5   : > { %p215_p3 = scmp.lt.s32.totalorder (!%p188_p2), %s1195_s19, 1  ;;  %s1354_s24 = smov (!%p188_p2), 16   ;;  %v1806_v2 = vmov (!%p188_p2), 0.0   ;;  %v1101_v3 = vld [vmem:[%s1800_s3 + $0x8] sm:$0xff] (!%p188_p2)  ;;  %v1100_v4 = vld [vmem:[%s1800_s3] sm:$0xff] (!%p188_p2)  ;;  %v1363_v5 = vmov (!%p188_p2), 0   ;;  %v235_v8 = vlaneseq (!%p188_p2) }
   0x6   : > { %191 = sbr.rel (%p188_p2) target bundleno = 433 (0x1b1), region = 40  ;;  %s1355_s25 = smov (!%p188_p2), 17   ;;  %460 = vmatprep.mubr.f32.mxu1 (!%p188_p2), %v1806_v2  ;;  %851 = vmatprep.mubr.f32.mxu0 (!%p188_p2), %v1806_v2  ;;  %v1116_v6 = vld [vmem:[%s1801_s4] sm:$0xff] (!%p188_p2)  ;;  %v1117_v7 = vld [vmem:[%s1801_s4 + $0x8] sm:$0xff] (!%p188_p2)  ;;  %vm371_vm2 = vcmask (!%p188_p2), 588800  }
   0x7   : > { %s1356_s26 = smov (!%p188_p2), 15   ;;  %s1357_s27 = smov (!%p188_p2), 1   ;;  %1345 = vset.pattern.permute.xlu1 (!%p188_p2), %v1363_v5  ;;  %1344 = vset.pattern.permute.xlu0 (!%p188_p2), %v1363_v5  ;;  %v1442_v9 = vshrl.u32 (!%p188_p2), %v235_v8, 7  ;;  %v1444_v10 = vand.u32 (!%p188_p2), 127, %v235_v8  ;;  %v1451_v13 = vld [vmem:[%s1799_s2] sm:$0xff] (!%p188_p2)  ;;  %v1456_v14 = vld [vmem:[%s1799_s2 + $0x8] sm:$0xff] (!%p188_p2) }
   0x8   : > { %s1358_s28 = smov (!%p188_p2), 127   ;;  %s1359_s29 = smov (!%p188_p2), 113   ;;  %v369_v18 = vld [vmem:[%s1798_s1] sm:$0xff] (!%p188_p2)  ;;  %v370_v48 = vld [vmem:[%s1798_s1 + $0x8] sm:$0xff] (!%p188_p2) }
   0x9   : > { %s1360_s30 = smov (!%p188_p2), 112   ;;  %s1362_s6 = smov (!%p188_p2), 111   ;;  %v259_v11 = vsub.s32 (!%p188_p2), 1, %v1442_v9  ;;  %v242_v12 = vsub.s32 (!%p188_p2), 0, %v1442_v9  ;;  %v276_v15 = vsub.s32 (!%p188_p2), 2, %v1442_v9  ;;  %vm254_vm0 = vcmp.lt.s32.totalorder (!%p188_p2), %v1444_v10, 16 }
   0xa   : > { %vm237_vm1 = vcmp.lt.s32.totalorder (!%p188_p2), %v1444_v10, 17  ;;  %vm271_vm3 = vcmp.lt.s32.totalorder (!%p188_p2), %v1444_v10, 15  ;;  %v293_v24 = vsub.s32 (!%p188_p2), 3, %v1442_v9  ;;  %v310_v28 = vsub.s32 (!%p188_p2), 5, %v1442_v9 }
   0xb   : > { %v260_v19 = vrot.slane (!%p188_p2), %v1451_v13, %v259_v11  ;;  %v264_v20 = vrot.slane (!%p188_p2), %v1456_v14, %v259_v11  ;;  %v243_v21 = vrot.slane (!%p188_p2), %v1451_v13, %v242_v12  ;;  %v247_v22 = vrot.slane (!%p188_p2), %v1456_v14, %v242_v12 }
   0xc   : > { %v277_v23 = vrot.slane (!%p188_p2), %v1451_v13, %v276_v15  ;;  %v281_v27 = vrot.slane (!%p188_p2), %v1456_v14, %v276_v15  ;;  %v373_v30 = vsel (!%p188_p2), %vm371_vm2, %v369_v18, 0  ;;  %vm288_vm4 = vcmp.lt.s32.totalorder (!%p188_p2), %v1444_v10, 1 }
   0xd   : > { %s1816_s19 = smov (!%p215_p3, %s1195_s19), 1  ;;  %v327_v39 = vsub.s32 6, %v1442_v9  ;;  %v1486_v41 = vand.u32 4294901760, %v373_v30  ;;  %v294_v50 = vrot.slane %v1451_v13, %v293_v24  ;;  %v298_v51 = vrot.slane %v1456_v14, %v293_v24 }
   0xe   : > { %s1208_s20 = sshll.u32 %s1816_s19, 4  ;;  %vm305_vm5 = vcmp.lt.s32.totalorder %v1444_v10, 127  ;;  %v311_v53 = vrot.slane %v1451_v13, %v310_v28  ;;  %v344_v55 = vsub.s32 7, %v1442_v9  ;;  %v376_v59 = vsel %vm371_vm2, %v370_v48, 0 }
   0xf   : > { %s219_s23 = scalar_lea.vmem %s1797_s0, %s1208_s20  ;;  %v315_v63 = vrot.slane %v1456_v14, %v310_v28  ;;  %vm322_vm6 = vcmp.lt.s32.totalorder %v1444_v10, 113  ;;  %v332_v11 = vrot.slane %v1456_v14, %v327_v39  ;;  %v1533_v12 = vand.u32 4294901760, %v376_v59 }
  0x10   : > { %v1408_v0 = vld [vmem:[%s219_s23] sm:$0xff]  ;;  %v1412_v1 = vld [vmem:[%s219_s23 + $0x8] sm:$0xff]  ;;  %vm339_vm7 = vcmp.lt.s32.totalorder %v1444_v10, 112  ;;  %v345_v15 = vrot.slane %v1451_v13, %v344_v55  ;;  %vm356_vm8 = vcmp.lt.s32.totalorder %v1444_v10, 111 }
  0x11   : > { %250 = vrot.lane.b32.xlu1 %v1408_v0, %s1354_s24  ;;  %231 = vrot.lane.b32.xlu0 %v1408_v0, %s1355_s25  ;;  %v394_v29 = vand.u32 4294901760, %v1412_v1  ;;  %v396_v40 = vand.u32 4294901760, %v1408_v0 }
  0x13   : > { %v1502_v54 = vsub.f32 %v1412_v1, %v394_v29  ;;  %v1512_v58 = vsub.f32 %v1408_v0, %v396_v40 }
  0x15   : > { %252 = vrot.lane.b32.xlu1 %v1412_v1, %s1354_s24  ;;  %233 = vrot.lane.b32.xlu0 %v1412_v1, %s1355_s25 }
  0x19   : > { %269 = vrot.lane.b32.xlu1 %v1412_v1, %s1356_s26  ;;  %267 = vrot.lane.b32.xlu0 %v1408_v0, %s1356_s26 }
  0x1d   : > { %286 = vrot.lane.b32.xlu1 %v1412_v1, %s1357_s27  ;;  %284 = vrot.lane.b32.xlu0 %v1408_v0, %s1357_s27 }
  0x21   : > { %303 = vrot.lane.b32.xlu1 %v1412_v1, %s1358_s28  ;;  %301 = vrot.lane.b32.xlu0 %v1408_v0, %s1358_s28 }
  0x25   : > { %320 = vrot.lane.b32.xlu1 %v1412_v1, %s1359_s29  ;;  %318 = vrot.lane.b32.xlu0 %v1408_v0, %s1359_s29  ;;  %s1209_s29 = sshll.u32 %s1816_s19, 5 }
  0x26   : > { %s224_s7 = scalar_lea.vmem %s1802_s5, %s1209_s29 }
  0x29   : > { %337 = vrot.lane.b32.xlu1 %v1412_v1, %s1360_s30  ;;  %335 = vrot.lane.b32.xlu0 %v1408_v0, %s1360_s30 }
  0x2d   : > { %354 = vrot.lane.b32.xlu1 %v1412_v1, %s1362_s6  ;;  %352 = vrot.lane.b32.xlu0 %v1408_v0, %s1362_s6 }
  0x31   : > { %1109 = vperm.xlu1 %1345, %v1101_v3   ;;  %1104 = vperm.xlu0 %1344, %v1100_v4   ;;  %v328_v3 = vrot.slane %v1451_v13, %v327_v39  ;;  %v1520_v4 = vsub.f32 %v373_v30, %v1486_v41 }
  0x35   : > { %1120 = vperm.xlu1 %1345, %v1116_v6   ;;  %1125 = vperm.xlu0 %1344, %v1117_v7  }
  0x83   : > { %v251_v16 = vpop.permute.xlu1 %250  ;;  %v232_v17 = vpop.permute.xlu0 %231 }
  0x87   : > { %v253_v25 = vpop.permute.xlu1 %252  ;;  %v234_v26 = vpop.permute.xlu0 %233 }
  0x88   : > { %v255_v31 = vsel %vm254_vm0, %v251_v16, %v253_v25  ;;  %v256_v32 = vsel %vm254_vm0, %v253_v25, %v251_v16  ;;  %v238_v33 = vsel %vm237_vm1, %v232_v17, %v234_v26  ;;  %v239_v34 = vsel %vm237_vm1, %v234_v26, %v232_v17 }
  0x89   : > { %v265_v35 = vmul.f32 %v260_v19, %v256_v32  ;;  %v266_v36 = vmul.f32 %v264_v20, %v255_v31  ;;  %v248_v37 = vmul.f32 %v243_v21, %v239_v34  ;;  %v249_v38 = vmul.f32 %v247_v22, %v238_v33 }
  0x8a   : > { %v1805_v16 = vand.u32 4294901760, %v1502_v54  ;;  %v1803_v17 = vand.u32 4294901760, %v1512_v58  ;;  %v1554_v31 = vsub.f32 %v376_v59, %v1533_v12 }
  0x8b   : > { %v382_v42 = vand.u32 4294901760, %v266_v36  ;;  %v384_v43 = vand.u32 4294901760, %v265_v35  ;;  %v378_v44 = vand.u32 4294901760, %v249_v38  ;;  %v380_v45 = vand.u32 4294901760, %v248_v37  ;;  %v270_v46 = vpop.permute.xlu1 %269  ;;  %v268_v47 = vpop.permute.xlu0 %267 }
  0x8c   : > { %v273_v49 = vsel %vm271_vm3, %v270_v46, %v268_v47  ;;  %v272_v52 = vsel %vm271_vm3, %v268_v47, %v270_v46  ;;  %v349_v47 = vrot.slane %v1456_v14, %v344_v55 }
  0x8d   : > { %v1505_v56 = vpack.c.bf16 %v382_v42, %v378_v44  ;;  %v1507_v57 = vpack.c.bf16 %v384_v43, %v380_v45  ;;  %v1515_v60 = vmul.f32 %v277_v23, %v273_v49  ;;  %v283_v5 = vmul.f32 %v281_v27, %v272_v52 }
  0x8e   : > { %v1540_v18 = vsub.f32 %v248_v37, %v380_v45  ;;  %v463_v23 = vand.u32 4294901760, %v1520_v4  ;;  %v1549_v27 = vsub.f32 %v265_v35, %v384_v43  ;;  %v1556_v32 = vsub.f32 %v266_v36, %v382_v42 }
  0x8f   : > { %v287_v61 = vpop.permute.xlu1 %286  ;;  %v285_v62 = vpop.permute.xlu0 %284  ;;  %1211 = vmatprep.subr.bf16.mxu1 %v1505_v56  ;;  %1259 = vmatprep.subr.bf16.mxu0 %v1505_v56  ;;  %v386_v24 = vand.u32 4294901760, %v283_v5  ;;  %v388_v25 = vand.u32 4294901760, %v1515_v60  ;;  %v1558_v33 = vsub.f32 %v249_v38, %v378_v44  ;;  %v1575_v38 = vsub.f32 %v1502_v54, %v1805_v16 }
  0x90   : > { %v289_v6 = vsel %vm288_vm4, %v285_v62, %v287_v61  ;;  %v290_v7 = vsel %vm288_vm4, %v287_v61, %v285_v62  ;;  %1213 = vmatpush1.bf16.msra.mxu1 %v1507_v57  ;;  %1261 = vmatpush1.bf16.msra.mxu0 %v1507_v57  ;;  %v491_v39 = vand.u32 4294901760, %v1540_v18  ;;  %v1580_v42 = vsub.f32 %v1512_v58, %v1803_v17 }
  0x91   : > { %v1529_v8 = vmul.f32 %v294_v50, %v290_v7  ;;  %v300_v9 = vmul.f32 %v298_v51, %v289_v6  ;;  %v503_v14 = vand.u32 4294901760, %v1549_v27  ;;  %v1589_v48 = vsub.f32 %v1520_v4, %v463_v23 }
  0x92   : > { %v1804_v49 = vand.u32 4294901760, %v1554_v31  ;;  %v485_v52 = vand.u32 4294901760, %v1558_v33  ;;  %v1606_v55 = vsub.f32 %v1540_v18, %v491_v39  ;;  %v1608_v59 = vsub.f32 %v283_v5, %v386_v24 }
  0x93   : > { %v390_v19 = vand.u32 4294901760, %v300_v9  ;;  %v392_v20 = vand.u32 4294901760, %v1529_v8  ;;  %v304_v21 = vpop.permute.xlu1 %303  ;;  %v302_v22 = vpop.permute.xlu0 %301  ;;  %v1622_v6 = vsub.f32 %v1515_v60, %v388_v25 }
  0x94   : > { %v306_v26 = vsel %vm305_vm5, %v302_v22, %v304_v21  ;;  %v307_v13 = vsel %vm305_vm5, %v304_v21, %v302_v22 }
  0x95   : > { %v1551_v28 = vmul.f32 %v311_v53, %v306_v26  ;;  %v317_v30 = vmul.f32 %v315_v63, %v307_v13  ;;  %v1560_v34 = vpack.c.bf16 %v390_v19, %v386_v24  ;;  %v1562_v37 = vpack.c.bf16 %v392_v20, %v388_v25  ;;  %v1205_v24 = vld [vmem:[%s1799_s2 + $0x18] ss:$0 sm:$0xff] }
  0x96   : > { %v497_v53 = vand.u32 4294901760, %v1556_v32  ;;  %v1610_v61 = vsub.f32 %v300_v9, %v390_v19  ;;  %v486_v19 = vsub.f32 %v1558_v33, %v485_v52 }
  0x97   : > { %v398_v45 = vand.u32 4294901760, %v317_v30  ;;  %v400_v35 = vand.u32 4294901760, %v1551_v28  ;;  %v321_v43 = vpop.permute.xlu1 %320  ;;  %v319_v46 = vpop.permute.xlu0 %318  ;;  %1215 = vmatprep.subr.bf16.mxu1 %v1560_v34  ;;  %1263 = vmatprep.subr.bf16.mxu0 %v1560_v34 }
  0x98   : > { %v323_v36 = vsel %vm322_vm6, %v319_v46, %v321_v43  ;;  %v324_v44 = vsel %vm322_vm6, %v321_v43, %v319_v46  ;;  %1217 = vmatpush1.bf16.msra.mxu1 %v1562_v37  ;;  %1265 = vmatpush1.bf16.msra.mxu0 %v1562_v37  ;;  %v498_v60 = vsub.f32 %v1556_v32, %v497_v53  ;;  %v521_v26 = vand.u32 4294901760, %v1610_v61  ;;  %v1204_v46 = vld [vmem:[%s1799_s2 + $0x10] ss:$0 sm:$0xff] }
  0x99   : > { %v1595_v50 = vpack.c.bf16 %v398_v45, %v394_v29  ;;  %v1599_v51 = vpack.c.bf16 %v400_v35, %v396_v40  ;;  %v1612_v1 = vmul.f32 %v328_v3, %v323_v36  ;;  %v334_v0 = vmul.f32 %v332_v11, %v324_v44 }
  0x9a   : > { %v1625_v3 = vsub.f32 %v1529_v8, %v392_v20  ;;  %v504_v11 = vsub.f32 %v1549_v27, %v503_v14  ;;  %v1641_v8 = vsub.f32 %v1554_v31, %v1804_v49  ;;  %v493_v44 = vand.u32 4294901760, %v1606_v55 }
  0x9b   : > { %v338_v29 = vpop.permute.xlu1 %337  ;;  %v336_v62 = vpop.permute.xlu0 %335  ;;  %1219 = vmatprep.subr.bf16.mxu1 %v1595_v50  ;;  %1267 = vmatprep.subr.bf16.mxu0 %v1595_v50  ;;  %v402_v13 = vand.u32 4294901760, %v334_v0  ;;  %v404_v43 = vand.u32 4294901760, %v1612_v1  ;;  %v499_v55 = vand.u32 4294901760, %v498_v60 }
  0x9c   : > { %v340_v40 = vsel %vm339_vm7, %v336_v62, %v338_v29  ;;  %v341_v63 = vsel %vm339_vm7, %v338_v29, %v336_v62  ;;  %1221 = vmatpush1.bf16.msra.mxu1 %v1599_v51  ;;  %1269 = vmatpush1.bf16.msra.mxu0 %v1599_v51  ;;  %v1808_v36 = vand.u32 4294901760, %v1625_v3  ;;  %v509_v29 = vand.u32 4294901760, %v1608_v59 }
  0x9d   : > { %v350_v7 = vmul.f32 %v345_v15, %v340_v40  ;;  %v351_v9 = vmul.f32 %v349_v47, %v341_v63  ;;  %v1643_v15 = vsub.f32 %v317_v30, %v398_v45  ;;  %v515_v47 = vand.u32 4294901760, %v1622_v6 }
  0x9e   : > { %v1662_v62 = vsub.f32 %v1551_v28, %v400_v35  ;;  %v505_v28 = vand.u32 4294901760, %v504_v11  ;;  %v1699_v5 = vsub.f32 %v1612_v1, %v404_v43 }
  0x9f   : > { %v406_v20 = vand.u32 4294901760, %v351_v9  ;;  %v408_v21 = vand.u32 4294901760, %v350_v7  ;;  %v355_v22 = vpop.permute.xlu1 %354  ;;  %v353_v25 = vpop.permute.xlu0 %352  ;;  %v545_v35 = vand.u32 4294901760, %v1643_v15  ;;  %v516_v11 = vsub.f32 %v1622_v6, %v515_v47 }
  0xa0   : > { %v357_v30 = vsel %vm356_vm8, %v353_v25, %v355_v22  ;;  %v358_v45 = vsel %vm356_vm8, %v355_v22, %v353_v25  ;;  %v487_v22 = vand.u32 4294901760, %v486_v19  ;;  %v522_v25 = vsub.f32 %v1610_v61, %v521_v26 }
  0xa1   : > { %v368_v40 = vmul.f32 %v1205_v24, %v358_v45  ;;  %v1664_v63 = vpack.c.bf16 %v406_v20, %v402_v13  ;;  %v1666_v17 = vpack.c.bf16 %v408_v21, %v404_v43  ;;  %v1668_v49 = vsub.f32 %v351_v9, %v406_v20 }
  0xa2   : > { %v367_v10 = vmul.f32 %v1204_v46, %v357_v30  ;;  %v528_v24 = vsub.f32 %v1625_v3, %v1808_v36  ;;  %v1679_v9 = vsub.f32 %v334_v0, %v402_v13  ;;  %v465_v19 = vand.u32 4294901760, %v1589_v48 }
  0xa3   : > { %v1671_v16 = vand.u32 4294901760, %v368_v40  ;;  %1223 = vmatprep.subr.bf16.mxu1 %v1664_v63  ;;  %1271 = vmatprep.subr.bf16.mxu0 %v1664_v63  ;;  %v510_v20 = vsub.f32 %v1608_v59, %v509_v29  ;;  %v551_v60 = vand.u32 4294901760, %v1662_v62  ;;  %v1689_v46 = vsub.f32 %v350_v7, %v408_v21 }
  0xa4   : > { %1225 = vmatpush1.bf16.msra.mxu1 %v1666_v17  ;;  %1273 = vmatpush1.bf16.msra.mxu0 %v1666_v17  ;;  %v476_v0 = vand.u32 4294901760, %v1641_v8  ;;  %v1694_v13 = vand.u32 4294901760, %v367_v10  ;;  %v523_v30 = vand.u32 4294901760, %v522_v25  ;;  %v546_v48 = vsub.f32 %v1643_v15, %v545_v35 }
  0xa5   : > { %411 = vmatprep.subr.mxu1 %v1671_v16  ;;  %802 = vmatprep.subr.mxu0 %v1671_v16  ;;  %v569_v45 = vand.u32 4294901760, %v1668_v49  ;;  %v1226_v2 = vpack.c.bf16 %v499_v55, %v487_v22  ;;  %v1274_v7 = vpack.c.bf16 %v497_v53, %v485_v52  ;;  %v1228_v21 = vpack.c.bf16 %v505_v28, %v493_v44 }
  0xa6   : > { %v1276_v8 = vpack.c.bf16 %v503_v14, %v491_v39  ;;  %v511_v25 = vand.u32 4294901760, %v510_v20  ;;  %v529_v36 = vand.u32 4294901760, %v528_v24  ;;  %v557_v1 = vand.u32 4294901760, %v1679_v9 }
  0xa7   : > { %v552_v43 = vsub.f32 %v1662_v62, %v551_v60  ;;  %v575_v22 = vand.u32 4294901760, %v1689_v46  ;;  %v1278_v52 = vpack.c.bf16 %v521_v26, %v509_v29  ;;  %v517_v53 = vand.u32 4294901760, %v516_v11 }
  0xa8   : > { %413 = vmatpush1.msra.mxu1 %v1694_v13  ;;  %804 = vmatpush1.msra.mxu0 %v1694_v13  ;;  %v1715_v44 = vsub.f32 %v368_v40, %v1671_v16  ;;  %v1230_v39 = vpack.c.bf16 %v523_v30, %v511_v25  ;;  %v547_v14 = vand.u32 4294901760, %v546_v48  ;;  %v570_v55 = vsub.f32 %v1668_v49, %v569_v45 }
  0xa9   : > { %1227 = vmatprep.subr.bf16.mxu1 %v1226_v2  ;;  %1275 = vmatprep.subr.bf16.mxu0 %v1274_v7  ;;  %v563_v28 = vand.u32 4294901760, %v1699_v5  ;;  %v1232_v2 = vpack.c.bf16 %v529_v36, %v517_v53  ;;  %v541_v26 = vand.u32 4294901760, %v1580_v42  ;;  %v558_v29 = vsub.f32 %v1679_v9, %v557_v1 }
  0xaa   : > { %466 = vmatmul.mubr.f32.vlgmr.msra.gmra.mrb[0].mxu1 %v465_v19  ;;  %855 = vmatmul.mubr.f32.vlgmr.msra.gmra.mrb[0].mxu0 %v463_v23  ;;  %v576_v40 = vsub.f32 %v1689_v46, %v575_v22  ;;  %v1725_v24 = vsub.f32 %v367_v10, %v1694_v13  ;;  %v1809_v23 = vand.u32 4294901760, %v1625_v3  ;;  %v553_v20 = vand.u32 4294901760, %v552_v43 }
  0xab   : > { %1229 = vmatpush1.bf16.msra.mxu1 %v1228_v21  ;;  %1277 = vmatpush1.bf16.msra.mxu0 %v1276_v8  ;;  %v1810_v11 = vmov 0.0   ;;  %v1811_v36 = vand.u32 4294901760, %v1575_v38  ;;  %v1812_v30 = vand.u32 4294901760, %v1502_v54  ;;  %v571_v7 = vand.u32 4294901760, %v570_v55 }
  0xac   : > { %1231 = vmatprep.subr.bf16.mxu1 %v1230_v39  ;;  %1279 = vmatprep.subr.bf16.mxu0 %v1278_v52  ;;  %v1280_v19 = vpack.c.bf16 %v1809_v23, %v515_v47  ;;  %v581_v10 = vand.u32 4294901760, %v1715_v44  ;;  %v1813_v21 = vand.u32 4294901760, %v1554_v31  ;;  %v564_v47 = vsub.f32 %v1699_v5, %v563_v28 }
  0xad   : > { %471 = vmatprep.mubr.f32.mxu1 %v1810_v11  ;;  %860 = vmatprep.mubr.f32.mxu0 %v1810_v11  ;;  %v1234_v42 = vpack.c.bf16 %v547_v14, %v1811_v36  ;;  %v1282_v48 = vpack.c.bf16 %v545_v35, %v1812_v30  ;;  %v559_v8 = vand.u32 4294901760, %v558_v29  ;;  %v587_v38 = vand.u32 4294901760, %v1725_v24 }
  0xae   : > { %477 = vmatmul.mubr.f32.gmra.mrb[2].mxu1 %v476_v0  ;;  %864 = vmatmul.mubr.f32.gmra.mrb[2].mxu0 %v1813_v21  ;;  %v1236_v25 = vpack.c.bf16 %v553_v20, %v541_v26  ;;  %v1814_v43 = vand.u32 4294901760, %v1512_v58  ;;  %v577_v52 = vand.u32 4294901760, %v576_v40  ;;  %v1286_v53 = vpack.c.bf16 %v569_v45, %v557_v1 }
  0xaf   : > { %1233 = vmatpush1.bf16.msra.mxu1 %v1232_v2  ;;  %1281 = vmatpush1.bf16.msra.mxu0 %v1280_v19  ;;  %v1238_v0 = vpack.c.bf16 %v571_v7, %v559_v8  ;;  %v582_v39 = vsub.f32 %v1715_v44, %v581_v10  ;;  %v565_v14 = vand.u32 4294901760, %v564_v47  ;;  %v1288_v2 = vpack.c.bf16 %v575_v22, %v563_v28 }
  0xb0   : > { %1235 = vmatprep.subr.bf16.mxu1 %v1234_v42  ;;  %1283 = vmatprep.subr.bf16.mxu0 %v1282_v48  ;;  %v1284_v35 = vpack.c.bf16 %v551_v60, %v1814_v43  ;;  %v588_v26 = vsub.f32 %v1725_v24, %v587_v38  ;;  %v1242_v45 = vpack.c.bf16 %v1556_v32, %v1558_v33 }
  0xb1   : > { %637 = vmatprep.mubr.f32.mxu1 %v1810_v11  ;;  %988 = vmatprep.mubr.f32.mxu0 %v1810_v11  ;;  %v1240_v55 = vpack.c.bf16 %v577_v52, %v565_v14  ;;  %v583_v29 = vand.u32 4294901760, %v582_v39  ;;  %v1244_v1 = vpack.c.bf16 %v1549_v27, %v1540_v18  ;;  %v1246_v22 = vpack.c.bf16 %v1610_v61, %v1608_v59 }
  0xb2   : > { %v589_v60 = vand.u32 4294901760, %v588_v26  ;;  %v1248_v32 = vpack.c.bf16 %v1625_v3, %v1622_v6  ;;  %v1256_v18 = vpack.c.bf16 %v1689_v46, %v1699_v5 }
  0xb3   : > { %1237 = vmatpush1.bf16.msra.mxu1 %v1236_v25  ;;  %1285 = vmatpush1.bf16.msra.mxu0 %v1284_v35 }
  0xb4   : > { %1239 = vmatprep.subr.bf16.mxu1 %v1238_v0  ;;  %1287 = vmatprep.subr.bf16.mxu0 %v1286_v53 }
  0xb7   : > { %1241 = vmatpush1.bf16.msra.mxu1 %v1240_v55  ;;  %1289 = vmatpush1.bf16.msra.mxu0 %v1288_v2 }
  0xb8   : > { %584 = vmatprep.subr.mxu1 %v583_v29  ;;  %937 = vmatprep.subr.mxu0 %v581_v10 }
  0xbb   : > { %590 = vmatpush1.msra.mxu1 %v589_v60  ;;  %941 = vmatpush1.msra.mxu0 %v587_v38 }
  0xbc   : > { %1243 = vmatprep.subr.bf16.mxu1 %v1242_v45  ;;  %1291 = vmatprep.subr.bf16.mxu0 %v1505_v56  ;;  %v1250_v56 = vpack.c.bf16 %v1643_v15, %v1502_v54  ;;  %v1254_v54 = vpack.c.bf16 %v1668_v49, %v1679_v9 }
  0xbd   : > { %639 = vmatmul.mubr.f32.vlgmr.msra.gmra.mrb[0].mxu1 %v1486_v41  ;;  %990 = vmatmul.mubr.f32.vlgmr.msra.gmra.mrb[0].mxu0 %v1486_v41 }
  0xbe   : > { %1245 = vmatpush1.bf16.msra.mxu1 %v1244_v1  ;;  %1293 = vmatpush1.bf16.msra.mxu0 %v1507_v57  ;;  %v1252_v57 = vpack.c.bf16 %v1662_v62, %v1512_v58  ;;  %v1110_v58 = vpop.permute.xlu1 %1109 }
  0xbf   : > { %1247 = vmatprep.subr.bf16.mxu1 %v1246_v22  ;;  %1295 = vmatprep.subr.bf16.mxu0 %v1560_v34 }
  0xc0   : > { %644 = vmatprep.mubr.f32.mxu1 %v1810_v11  ;;  %995 = vmatprep.mubr.f32.mxu0 %v1810_v11 }
  0xc1   : > { %646 = vmatmul.mubr.f32.gmra.mrb[2].mxu1 %v1533_v12  ;;  %997 = vmatmul.mubr.f32.gmra.mrb[2].mxu0 %v1533_v12 }
  0xc2   : > { %1249 = vmatpush1.bf16.msra.mxu1 %v1248_v32  ;;  %1297 = vmatpush1.bf16.msra.mxu0 %v1562_v37 }
  0xc3   : > { %1251 = vmatprep.subr.bf16.mxu1 %v1250_v56  ;;  %1299 = vmatprep.subr.bf16.mxu0 %v1595_v50 }
  0xc4   : > { %752 = vmatprep.mubr.f32.mxu1 %v1810_v11  ;;  %1085 = vmatprep.mubr.f32.mxu0 %v1810_v11 }
  0xc6   : > { %1253 = vmatpush1.bf16.msra.mxu1 %v1252_v57  ;;  %1301 = vmatpush1.bf16.msra.mxu0 %v1599_v51 }
  0xc7   : > { %1255 = vmatprep.subr.bf16.mxu1 %v1254_v54  ;;  %1303 = vmatprep.subr.bf16.mxu0 %v1664_v63 }
  0xca   : > { %1257 = vmatpush1.bf16.msra.mxu1 %v1256_v18  ;;  %1305 = vmatpush1.bf16.msra.mxu0 %v1666_v17  ;;  %v1105_v17 = vpop.permute.xlu0 %1104 }
  0xcb   : > { %702 = vmatprep.subr.mxu1 %v1715_v44  ;;  %1036 = vmatprep.subr.mxu0 %v1671_v16 }
  0xce   : > { %705 = vmatpush1.msra.mxu1 %v1725_v24  ;;  %1038 = vmatpush1.msra.mxu0 %v1694_v13  ;;  %v1126_v9 = vpop.permute.xlu0 %1125 }
  0xcf   : > { %755 = vmatmul.mubr.f32.vlgmr.msra.gmra.mrb[0].mxu1 %v1520_v4  ;;  %1087 = vmatmul.mubr.f32.vlgmr.msra.gmra.mrb[0].mxu0 %v1486_v41  ;;  %v1121_v4 = vpop.permute.xlu1 %1120 }
  0xd0   : > { %760 = vmatprep.mubr.f32.mxu1 %v1810_v11  ;;  %1092 = vmatprep.mubr.f32.mxu0 %v1810_v11 }
  0xd3   : > { %763 = vmatmul.mubr.f32.gmra.mrb[2].mxu1 %v1554_v31  ;;  %1094 = vmatmul.mubr.f32.gmra.mrb[2].mxu0 %v1533_v12 }
 0x1a2   : > { %v756_v16 = vpop.f32.mrb[0].mxu1  ;;  %v1088_v27 = vpop.f32.mrb[0].mxu0 }
 0x1a3   : > { %v1306_v33 = vadd.f32 %v1088_v27, %v756_v16  ;;  %v758_v34 = vpop.f32.mrb[1].mxu1  ;;  %v1090_v37 = vpop.f32.mrb[1].mxu0 }
 0x1a4   : > { %v1307_v49 = vadd.f32 %v1090_v37, %v758_v34 }
 0x1a5   : > { %v1112_v50 = vmul.f32 %v1306_v33, %v1105_v17 }
 0x1a6   : > { %v1113_v41 = vmul.f32 %v1307_v49, %v1105_v17  ;;  %v764_v51 = vpop.f32.mrb[2].mxu1  ;;  %v1095_v59 = vpop.f32.mrb[2].mxu0 }
 0x1a7   : > { %v1128_v61 = vadd.f32 %v1121_v4, %v1112_v50  ;;  %v1308_v5 = vadd.f32 %v1095_v59, %v764_v51  ;;  %v766_v6 = vpop.f32.mrb[3].mxu1  ;;  %v1097_v31 = vpop.f32.mrb[3].mxu0 }
 0x1a8   : > { %v1129_v12 = vadd.f32 %v1121_v4, %v1113_v41  ;;  %v1309_v3 = vadd.f32 %v1097_v31, %v766_v6 }
 0x1a9   : > { %v1132_v15 = vmax.f32 %v1128_v61, 0.0  ;;  %v1114_v62 = vmul.f32 %v1308_v5, %v1110_v58 }
 0x1aa   : > { %v1133_v63 = vmax.f32 %v1129_v12, 0.0  ;;  %v1115_v46 = vmul.f32 %v1309_v3, %v1110_v58 }
 0x1ab   : > { %1136 = vst [vmem:[%s224_s7] sm:$0xff] %v1132_v15  ;;  %v1130_v13 = vadd.f32 %v1126_v9, %v1114_v62 }
 0x1ac   : > { %1137 = vst [vmem:[%s224_s7 + $0x8] sm:$0xff] %v1133_v63  ;;  %v1131_v44 = vadd.f32 %v1126_v9, %v1115_v46 }
 0x1ad   : > { %v1134_v28 = vmax.f32 %v1130_v13, 0.0 }
 0x1ae   : > { %v1135_v40 = vmax.f32 %v1131_v44, 0.0 }
 0x1af   : > { %1138 = vst [vmem:[%s224_s7 + $0x10] sm:$0xff] %v1134_v28 }
 0x1b0   : > { %1139 = vst [vmem:[%s224_s7 + $0x18] sm:$0xff] %v1135_v40 }
 0x1b1 PF: > { %s15_s18 = sadd.s32 1, %s1352_s18  }
 0x1b2   : > { %p12_p4 = scmp.ge.s32.totalorder %s15_s18, 4  }
 0x1b4   :  { %14 = sbr.rel (!%p12_p4) target bundleno = 1 (0x1), region = 70 }

</bundles_post_ra>
